<compile_context>
chip_gen: v7x
topology: tpu7x:2x2x1
jax: 0.10.0
libtpu: 0.0.40
codegen_flags: <defaults>
</compile_context>

<pallas_src>
import math

import jax
import jax.numpy as jnp
from jax.experimental import pallas as pl
from jax.experimental.pallas import tpu as pltpu

H1, H2, OUT_DIM = 128, 64, 2
OUT_PAD = 128  # last-layer weight padded 2 -> 128 for the MXU (store is sliced)


def _round_up(n, m):
    return ((n + m - 1) // m) * m


def _vmem_capacity_bytes():
    """Physical VMEM per TensorCore; conservative v7x fallback if unqueryable."""
    try:
        info = pltpu.get_tpu_info()
        cap = getattr(info, "vmem_capacity_bytes", None)
        if cap:
            return int(cap)
    except Exception:
        pass
    return 64 << 20  # v7x per-TC physical VMEM (smallest of v5e/v6e/v7x)


def mlp_kernel(x_ref, w1_ref, b1_ref, w2_ref, b2_ref, w3_ref, b3_ref, o_ref):
    """Fused 3-layer MLP on one batch tile.

    MXU operands are bf16 (x cast in-kernel); accumulation and bias/ReLU stay
    f32 (v5e's VPU has no bf16 path; free on v6e/v7x). Only the first OUT_DIM
    output lanes are stored.
    """
    x = x_ref[...].astype(jnp.bfloat16)                       # [tile_b, input_dim]
    h1 = jnp.dot(x, w1_ref[...], preferred_element_type=jnp.float32) + b1_ref[...]
    h1 = jnp.maximum(h1, 0.0)
    h2 = jnp.dot(h1.astype(jnp.bfloat16), w2_ref[...],
                 preferred_element_type=jnp.float32) + b2_ref[...]
    h2 = jnp.maximum(h2, 0.0)
    out = jnp.dot(h2.astype(jnp.bfloat16), w3_ref[...],
                  preferred_element_type=jnp.float32) + b3_ref[...]
    o_ref[...] = out[:, :OUT_DIM].astype(o_ref.dtype)          # narrow store


def mlp_forward(x, params, *, tile_b=8192):
    """x: [B, input_dim] float32. params: w1,b1,w2,b2,w3,b3 (f32, [in,out]/[1,out]).

    Returns f32 [B, 2].
    """
    B, input_dim = x.shape

    # bf16 MXU operands; biases stay f32 so elementwise math is f32 in-kernel.
    w1 = params["w1"].astype(jnp.bfloat16)
    w2 = params["w2"].astype(jnp.bfloat16)
    w3 = (jnp.zeros((H2, OUT_PAD), jnp.float32)
          .at[:, :OUT_DIM].set(params["w3"]).astype(jnp.bfloat16))
    b1 = params["b1"].astype(jnp.float32)
    b2 = params["b2"].astype(jnp.float32)
    b3 = jnp.zeros((1, OUT_PAD), jnp.float32).at[:, :OUT_DIM].set(params["b3"])

    weight_bytes = ((w1.size + w2.size + w3.size) * 2
                    + (b1.size + b2.size + b3.size) * 4)

    # --- Generation-aware tile sizing -------------------------------------
    cap = _vmem_capacity_bytes()
    buf_budget = min(cap // 2, 40 << 20)          # target for all VMEM buffers
    vmem_limit = min((cap * 3) // 4, buf_budget + (16 << 20))
    # Per-row VMEM: x f32 dbl-buf + out f32 dbl-buf + f32/bf16 temporaries.
    per_row = (2 * input_dim * 4 + 2 * OUT_DIM * 4
               + input_dim * 2 + H1 * 6 + H2 * 6 + OUT_PAD * 4)
    vmem_rows = max(8, ((buf_budget - weight_bytes) // per_row) // 8 * 8)

    eff_tile = min(_round_up(tile_b, 8), vmem_rows)
    if B > 8:
        # Aim for >= 2 grid steps so v7x megacore has work on both TCs.
        eff_tile = min(eff_tile, _round_up((B + 1) // 2, 8))
    eff_tile = max(8, min(eff_tile, _round_up(B, 8)))

    b_pad = _round_up(B, eff_tile)
    x_p = x
    if b_pad != B:
        x_p = jnp.pad(x_p, ((0, b_pad - B), (0, 0)))

    grid = (b_pad // eff_tile,)

    def resident(shape):  # full block, VMEM-resident across all grid steps
        return pl.BlockSpec(shape, lambda i: (0,) * len(shape))

    flops = 2 * b_pad * (input_dim * H1 + H1 * H2 + H2 * OUT_PAD)
    bytes_accessed = (b_pad * input_dim * 4      # x read (f32)
                      + b_pad * OUT_DIM * 4      # narrow f32 output write
                      + weight_bytes)            # weights streamed once

    out = pl.pallas_call(
        mlp_kernel,
        out_shape=jax.ShapeDtypeStruct((b_pad, OUT_DIM), jnp.float32),
        grid=grid,
        in_specs=[
            pl.BlockSpec((eff_tile, input_dim), lambda i: (i, 0)),
            resident(w1.shape), resident(b1.shape),
            resident(w2.shape), resident(b2.shape),
            resident(w3.shape), resident(b3.shape),
        ],
        out_specs=pl.BlockSpec((eff_tile, OUT_DIM), lambda i: (i, 0)),
        compiler_params=pltpu.CompilerParams(
            dimension_semantics=("parallel",),
            vmem_limit_bytes=int(vmem_limit)),
        cost_estimate=pl.CostEstimate(
            flops=flops, transcendentals=0, bytes_accessed=bytes_accessed),
    )(x_p, w1, b1, w2, b2, w3, b3)

    return out[:B, :]


def init_params(key, input_dim):
    """Deterministic init matching nn.Linear's U(-1/sqrt(fan_in), 1/sqrt(fan_in))."""
    dims = [(input_dim, H1), (H1, H2), (H2, OUT_DIM)]
    params = {}
    keys = jax.random.split(key, 2 * len(dims))
    for i, (fan_in, fan_out) in enumerate(dims):
        bound = 1.0 / math.sqrt(fan_in)
        params[f"w{i+1}"] = jax.random.uniform(
            keys[2 * i], (fan_in, fan_out), jnp.float32, -bound, bound)
        params[f"b{i+1}"] = jax.random.uniform(
            keys[2 * i + 1], (1, fan_out), jnp.float32, -bound, bound)
    return params


def mlp_reference(x, params):
    """Pure-JAX reference mirroring the kernel's bf16-operand / f32-accumulate path."""
    bf = lambda a: a.astype(jnp.bfloat16).astype(jnp.float32)
    h1 = jnp.maximum(bf(x) @ bf(params["w1"]) + params["b1"], 0.0)
    h2 = jnp.maximum(bf(h1) @ bf(params["w2"]) + params["b2"], 0.0)
    return bf(h2) @ bf(params["w3"]) + params["b3"]


if __name__ == "__main__":
    key = jax.random.PRNGKey(0)
    k_param, k_x1, k_x2 = jax.random.split(key, 3)

    input_dim = 32
    params = init_params(k_param, input_dim)

    # Case 1: small batch, single grid step.
    x1 = jax.random.normal(k_x1, (8, input_dim), jnp.float32)
    out1 = jax.block_until_ready(mlp_forward(x1, params))
    ref1 = mlp_reference(x1, params)
    assert out1.shape == (8, OUT_DIM)
    assert jnp.allclose(out1, ref1, atol=2e-3, rtol=2e-3), (
        f"case1 max abs err = {jnp.max(jnp.abs(out1 - ref1))}")

    # Case 2: B not a multiple of the tile -> multi-step grid + padded batch rows.
    x2 = jax.random.normal(k_x2, (20, input_dim), jnp.float32)
    out2 = jax.block_until_ready(mlp_forward(x2, params, tile_b=8))
    ref2 = mlp_reference(x2, params)
    assert out2.shape == (20, OUT_DIM)
    assert jnp.allclose(out2, ref2, atol=2e-3, rtol=2e-3), (
        f"case2 max abs err = {jnp.max(jnp.abs(out2 - ref2))}")

    print("KERNEL_OK")
</pallas_src>

<mosaic_0001>
module attributes {stable_mosaic.version = 11 : i64} {
  func.func @mlp_kernel(%arg0: i32, %arg1: memref<8x32xf32, #tpu.memory_space<vmem>>, %arg2: memref<32x128xbf16, #tpu.memory_space<vmem>>, %arg3: memref<1x128xf32, #tpu.memory_space<vmem>>, %arg4: memref<128x64xbf16, #tpu.memory_space<vmem>>, %arg5: memref<1x64xf32, #tpu.memory_space<vmem>>, %arg6: memref<64x128xbf16, #tpu.memory_space<vmem>>, %arg7: memref<1x128xf32, #tpu.memory_space<vmem>>, %arg8: memref<8x2xf32, #tpu.memory_space<vmem>>) attributes {dimension_semantics = [#tpu.dimension_semantics<parallel>], iteration_bounds = array<i64: 1>, scalar_prefetch = 0 : i64, scratch_operands = 0 : i64, tpu.core_type = #tpu.core_type<tc>, window_params = [{transform_indices = @transform_0, window_bounds = array<i64: 8, 32>}, {pipeline_mode = #tpu.pipeline_mode<synchronous>, transform_indices = @transform_1, window_bounds = array<i64: 32, 128>}, {pipeline_mode = #tpu.pipeline_mode<synchronous>, transform_indices = @transform_2, window_bounds = array<i64: 1, 128>}, {pipeline_mode = #tpu.pipeline_mode<synchronous>, transform_indices = @transform_3, window_bounds = array<i64: 128, 64>}, {pipeline_mode = #tpu.pipeline_mode<synchronous>, transform_indices = @transform_4, window_bounds = array<i64: 1, 64>}, {pipeline_mode = #tpu.pipeline_mode<synchronous>, transform_indices = @transform_5, window_bounds = array<i64: 64, 128>}, {pipeline_mode = #tpu.pipeline_mode<synchronous>, transform_indices = @transform_6, window_bounds = array<i64: 1, 128>}, {transform_indices = @transform_7, window_bounds = array<i64: 8, 2>}]} {
    %c0 = arith.constant 0 : index
    %c0_0 = arith.constant 0 : index
    %0 = vector.load %arg1[%c0, %c0_0] : memref<8x32xf32, #tpu.memory_space<vmem>>, vector<8x32xf32>
    %1 = arith.truncf %0 : vector<8x32xf32> to vector<8x32xbf16>
    %c0_1 = arith.constant 0 : index
    %c0_2 = arith.constant 0 : index
    %2 = vector.load %arg2[%c0_1, %c0_2] : memref<32x128xbf16, #tpu.memory_space<vmem>>, vector<32x128xbf16>
    %cst = arith.constant dense<0.000000e+00> : vector<8x128xf32>
    %3 = tpu.matmul %1, %2, %cst {dimension_numbers = #tpu.dot_dimension_numbers<[1], [0], [0], [1], [0, 0, 1, 1], [], []>} : vector<8x32xbf16>, vector<32x128xbf16>, vector<8x128xf32> -> vector<8x128xf32>
    %c0_3 = arith.constant 0 : index
    %c0_4 = arith.constant 0 : index
    %4 = vector.load %arg3[%c0_3, %c0_4] : memref<1x128xf32, #tpu.memory_space<vmem>>, vector<1x128xf32>
    %5 = vector.broadcast %4 : vector<1x128xf32> to vector<8x128xf32>
    %6 = arith.addf %3, %5 : vector<8x128xf32>
    %cst_5 = arith.constant 0.000000e+00 : f32
    %7 = vector.broadcast %cst_5 : f32 to vector<8x128xf32>
    %8 = arith.maximumf %6, %7 : vector<8x128xf32>
    %9 = arith.truncf %8 : vector<8x128xf32> to vector<8x128xbf16>
    %c0_6 = arith.constant 0 : index
    %c0_7 = arith.constant 0 : index
    %10 = vector.load %arg4[%c0_6, %c0_7] : memref<128x64xbf16, #tpu.memory_space<vmem>>, vector<128x64xbf16>
    %cst_8 = arith.constant dense<0.000000e+00> : vector<8x64xf32>
    %11 = tpu.matmul %9, %10, %cst_8 {dimension_numbers = #tpu.dot_dimension_numbers<[1], [0], [0], [1], [0, 0, 1, 1], [], []>} : vector<8x128xbf16>, vector<128x64xbf16>, vector<8x64xf32> -> vector<8x64xf32>
    %c0_9 = arith.constant 0 : index
    %c0_10 = arith.constant 0 : index
    %12 = vector.load %arg5[%c0_9, %c0_10] : memref<1x64xf32, #tpu.memory_space<vmem>>, vector<1x64xf32>
    %13 = vector.broadcast %12 : vector<1x64xf32> to vector<8x64xf32>
    %14 = arith.addf %11, %13 : vector<8x64xf32>
    %cst_11 = arith.constant 0.000000e+00 : f32
    %15 = vector.broadcast %cst_11 : f32 to vector<8x64xf32>
    %16 = arith.maximumf %14, %15 : vector<8x64xf32>
    %17 = arith.truncf %16 : vector<8x64xf32> to vector<8x64xbf16>
    %c0_12 = arith.constant 0 : index
    %c0_13 = arith.constant 0 : index
    %18 = vector.load %arg6[%c0_12, %c0_13] : memref<64x128xbf16, #tpu.memory_space<vmem>>, vector<64x128xbf16>
    %cst_14 = arith.constant dense<0.000000e+00> : vector<8x128xf32>
    %19 = tpu.matmul %17, %18, %cst_14 {dimension_numbers = #tpu.dot_dimension_numbers<[1], [0], [0], [1], [0, 0, 1, 1], [], []>} : vector<8x64xbf16>, vector<64x128xbf16>, vector<8x128xf32> -> vector<8x128xf32>
    %c0_15 = arith.constant 0 : index
    %c0_16 = arith.constant 0 : index
    %20 = vector.load %arg7[%c0_15, %c0_16] : memref<1x128xf32, #tpu.memory_space<vmem>>, vector<1x128xf32>
    %21 = vector.broadcast %20 : vector<1x128xf32> to vector<8x128xf32>
    %22 = arith.addf %19, %21 : vector<8x128xf32>
    %23 = vector.extract_strided_slice %22 {offsets = [0, 0], sizes = [8, 2], strides = [1, 1]} : vector<8x128xf32> to vector<8x2xf32>
    %c0_17 = arith.constant 0 : index
    %c0_18 = arith.constant 0 : index
    %24 = vector.load %arg8[%c0_17, %c0_18] : memref<8x2xf32, #tpu.memory_space<vmem>>, vector<8x2xf32>
    tpu.vector_store %arg8[%c0_17, %c0_18], %23 {strides = array<i32>} : memref<8x2xf32, #tpu.memory_space<vmem>>, vector<8x2xf32>,
    return
  }
  func.func @transform_0(%arg0: i32) -> (i32, i32) {
    %c0_i32 = arith.constant 0 : i32
    %c0_i32_0 = arith.constant 0 : i32
    return %arg0, %c0_i32 : i32, i32
  }
  func.func @transform_1(%arg0: i32) -> (i32, i32) {
    %c0_i32 = arith.constant 0 : i32
    %c0_i32_0 = arith.constant 0 : i32
    %c0_i32_1 = arith.constant 0 : i32
    return %c0_i32, %c0_i32_0 : i32, i32
  }
  func.func @transform_2(%arg0: i32) -> (i32, i32) {
    %c0_i32 = arith.constant 0 : i32
    %c0_i32_0 = arith.constant 0 : i32
    %c0_i32_1 = arith.constant 0 : i32
    return %c0_i32, %c0_i32_0 : i32, i32
  }
  func.func @transform_3(%arg0: i32) -> (i32, i32) {
    %c0_i32 = arith.constant 0 : i32
    %c0_i32_0 = arith.constant 0 : i32
    %c0_i32_1 = arith.constant 0 : i32
    return %c0_i32, %c0_i32_0 : i32, i32
  }
  func.func @transform_4(%arg0: i32) -> (i32, i32) {
    %c0_i32 = arith.constant 0 : i32
    %c0_i32_0 = arith.constant 0 : i32
    %c0_i32_1 = arith.constant 0 : i32
    return %c0_i32, %c0_i32_0 : i32, i32
  }
  func.func @transform_5(%arg0: i32) -> (i32, i32) {
    %c0_i32 = arith.constant 0 : i32
    %c0_i32_0 = arith.constant 0 : i32
    %c0_i32_1 = arith.constant 0 : i32
    return %c0_i32, %c0_i32_0 : i32, i32
  }
  func.func @transform_6(%arg0: i32) -> (i32, i32) {
    %c0_i32 = arith.constant 0 : i32
    %c0_i32_0 = arith.constant 0 : i32
    %c0_i32_1 = arith.constant 0 : i32
    return %c0_i32, %c0_i32_0 : i32, i32
  }
  func.func @transform_7(%arg0: i32) -> (i32, i32) {
    %c0_i32 = arith.constant 0 : i32
    %c0_i32_0 = arith.constant 0 : i32
    return %arg0, %c0_i32 : i32, i32
  }
}

</mosaic_0001>

<bundles_post_ra>
// kernel: tpu_custom_call.1
= control target key start
LH: loop header
LB: loop body
LE: loop exit
PB: predicated region body
PF: predicated region fallthrough
CT: control target
= control target key end

     0   :  { %v392_v0 = vmov 0.0   ;;  %vm393_vm0 = vmmov 0   ;;  %vm52_vm1 = vcmask 261120   ;;  %vm250_vm2 = vcmask 523264   ;;  %s494_s1 = inlined_call_operand.vmem [shape: bf16[32,128], index: 1, kind: input, shape index: {}]   ;;  %s495_s0 = inlined_call_operand.vmem [shape: f32[8,32], index: 0, kind: input, shape index: {}]   ;;  %s496_s3 = inlined_call_operand.vmem [shape: bf16[128,64], index: 3, kind: input, shape index: {}]   ;;  %s497_s5 = inlined_call_operand.vmem [shape: bf16[64,128], index: 5, kind: input, shape index: {}]   ;;  %s498_s2 = inlined_call_operand.vmem [shape: f32[1,128], index: 2, kind: input, shape index: {}]   ;;  %s499_s4 = inlined_call_operand.vmem [shape: f32[1,64], index: 4, kind: input, shape index: {}]   ;;  %s500_s6 = inlined_call_operand.vmem [shape: f32[1,128], index: 6, kind: input, shape index: {}]   ;;  %s501_s7 = inlined_call_operand.vmem [shape: f32[8,2], index: 7, kind: output, shape index: {}]  }
   0x1   :  { %336 = vmatprep.subr.bf16.mxu0 %v392_v0  ;;  %v378_v1 = vld [vmem:[%s494_s1] sm:$0xff]   ;;  %340 = vmatprep.mubr.msk.bf16.mxu0 %vm393_vm0, %v392_v0  ;;  %v379_v2 = vld [vmem:[%s494_s1 + $0x8] sm:$0xff]   ;;  %v382_v7 = vld [vmem:[%s496_s3 + $0x10] sm:$0xff]   ;;  %vm294_vm3 = vcmask 15360  }
   0x2   :  { %344 = vmatprep.subr.bf16.mxu1 %v392_v0  ;;  %360 = vmatprep.mubr.msk.bf16.mxu1 %vm393_vm0, %v392_v0  ;;  %v27_v3 = vld [vmem:[%s495_s0] sm:$0xff]  ;;  %v381_v6 = vld [vmem:[%s496_s3 + $0x8] sm:$0xff]   ;;  %v383_v8 = vld [vmem:[%s496_s3 + $0x18] sm:$0xff]  }
   0x3   :  { %337 = vmatpush3.bf16.msra.mxu0 %v378_v1  ;;  %v380_v4 = vld [vmem:[%s496_s3] sm:$0xff]   ;;  %v28_v5 = vpack.c.bf16 %v27_v3, %v27_v3  ;;  %v385_v10 = vld [vmem:[%s496_s3 + $0x28] sm:$0xff]   ;;  %v386_v11 = vld [vmem:[%s496_s3 + $0x30] sm:$0xff]  }
   0x4   :  { %338 = vmatprep.subr.bf16.mxu0 %v392_v0  ;;  %345 = vmatpush3.bf16.msra.mxu1 %v380_v4  ;;  %v384_v9 = vld [vmem:[%s496_s3 + $0x20] sm:$0xff]   ;;  %v387_v12 = vld [vmem:[%s496_s3 + $0x38] sm:$0xff]   ;;  %v389_v14 = vld [vmem:[%s497_s5 + $0x8] sm:$0xff]  }
   0x5   :  { %346 = vmatprep.subr.bf16.mxu1 %v392_v0  ;;  %v388_v13 = vld [vmem:[%s497_s5] sm:$0xff]   ;;  %v390_v23 = vld [vmem:[%s497_s5 + $0x10] sm:$0xff]   ;;  %v391_v24 = vld [vmem:[%s497_s5 + $0x18] sm:$0xff]  }
   0x6   :  { %v300_v15 = vld [vmem:[%s498_s2] ss:$0 sm:$0xff] }
   0x7   :  { %339 = vmatpush3.bf16.msra.mxu0 %v379_v2  ;;  %v304_v25 = vld [vmem:[%s499_s4] ss:$0 sm:$0xff] }
   0x8   :  { %364 = vmatprep.subr.bf16.mxu0 %v392_v0  ;;  %347 = vmatpush3.bf16.msra.mxu1 %v381_v6  ;;  %v313_v33 = vld [vmem:[%s500_s6] ss:$0 sm:$0xff] }
   0x9   :  { %348 = vmatprep.subr.bf16.mxu1 %v392_v0 }
   0xa   :  { %341 = vmatmul.mubr.msk.bf16.vlgmr.msra.gmra.mrb[0].mxu0 %vm52_vm1, %v28_v5 }
   0xb   :  { %372 = vmatprep.mubr.msk.bf16.mxu0 %vm393_vm0, %v392_v0  ;;  %365 = vmatpush3.bf16.msra.mxu0 %v388_v13 }
   0xc   :  { %349 = vmatpush3.bf16.msra.mxu1 %v382_v7  ;;  %366 = vmatprep.subr.bf16.mxu0 %v392_v0 }
   0xd   :  { %350 = vmatprep.subr.bf16.mxu1 %v392_v0 }
   0xf   :  { %367 = vmatpush3.bf16.msra.mxu0 %v389_v14 }
  0x10   :  { %351 = vmatpush3.bf16.msra.mxu1 %v383_v8  ;;  %368 = vmatprep.subr.bf16.mxu0 %v392_v0 }
  0x11   :  { %352 = vmatprep.subr.bf16.mxu1 %v392_v0 }
  0x13   :  { %369 = vmatpush3.bf16.msra.mxu0 %v390_v23 }
  0x14   :  { %353 = vmatpush3.bf16.msra.mxu1 %v384_v9  ;;  %370 = vmatprep.subr.bf16.mxu0 %v392_v0 }
  0x15   :  { %354 = vmatprep.subr.bf16.mxu1 %v392_v0 }
  0x17   :  { %371 = vmatpush3.bf16.msra.mxu0 %v391_v24 }
  0x18   :  { %355 = vmatpush3.bf16.msra.mxu1 %v385_v10 }
  0x19   :  { %356 = vmatprep.subr.bf16.mxu1 %v392_v0 }
  0x1c   :  { %357 = vmatpush3.bf16.msra.mxu1 %v386_v11 }
  0x1d   :  { %358 = vmatprep.subr.bf16.mxu1 %v392_v0 }
  0x20   :  { %359 = vmatpush3.bf16.msra.mxu1 %v387_v12 }
  0xdd   :  { %v90_v16 = vpop.f32.mrb[0].mxu0 }
  0xde   :  { %v91_v17 = vadd.f32 %v300_v15, %v90_v16  ;;  %v342_v18 = vpop.f32.mrb[1].mxu0 }
  0xdf   :  { %v93_v19 = vpop.f32.mrb[2].mxu0 }
  0xe0   :  { %v96_v20 = vmax.f32 %v91_v17, 0.0  ;;  %v343_v21 = vpop.f32.mrb[3].mxu0 }
  0xe2   :  { %v97_v22 = vpack.c.bf16 %v96_v20, %v96_v20 }
  0xe4   :  { %361 = vmatmul.mubr.bf16.vlgmr.msra.gmra.mrb[0].mxu1 %v97_v22 }
 0x1b7   :  { %v203_v26 = vpop.f32.mrb[0].mxu1 }
 0x1b8   :  { %v204_v27 = vadd.f32 %v304_v25, %v203_v26  ;;  %v362_v28 = vpop.f32.mrb[1].mxu1 }
 0x1b9   :  { %v206_v29 = vpop.f32.mrb[2].mxu1 }
 0x1ba   :  { %v209_v30 = vmax.f32 %v204_v27, 0.0  ;;  %v363_v31 = vpop.f32.mrb[3].mxu1 }
 0x1bc   :  { %v210_v32 = vpack.c.bf16 %v209_v30, %v209_v30 }
 0x1be   :  { %373 = vmatmul.mubr.msk.bf16.vlgmr.msra.gmra.mrb[4].mxu0 %vm250_vm2, %v210_v32 }
 0x291   :  { %v288_v34 = vpop.f32.mrb[4].mxu0 }
 0x292   :  { %v289_v35 = vadd.f32 %v313_v33, %v288_v34  ;;  %v374_v36 = vpop.f32.mrb[5].mxu0 }
 0x293   :  { %v291_v37 = vpop.f32.mrb[6].mxu0 }
 0x294   :  { %295 = vst.msk [vmem:[%s501_s7] sm:$0xff] %vm294_vm3, %v289_v35  ;;  %v375_v38 = vpop.f32.mrb[7].mxu0 }

</bundles_post_ra>
